<compile_context>
chip_gen: v7x
topology: tpu7x:2x2x1
jax: 0.10.0
libtpu: 0.0.40
codegen_flags: <defaults>
</compile_context>

<pallas_src>
import functools

import jax
import jax.numpy as jnp
from jax.experimental import pallas as pl
from jax.experimental.pallas import tpu as pltpu

_LANES = 128
_FACTOR = 20.0  # self.factor in the PyTorch module


@functools.lru_cache(maxsize=1)
def _device_kind() -> str:
    try:
        return jax.devices()[0].device_kind.lower()
    except Exception:  # no accelerator visible at trace time
        return ""


def _is_v7x() -> bool:
    kind = _device_kind()
    return ("v7" in kind) or ("7x" in kind)


def _make_kernel(rows, block_rows, steps, needs_mask):
    """Build the streaming-reduction kernel with all static sizes baked in."""

    def kernel(x_ref, y_ref, o_ref):
        c = pl.program_id(0)          # core-split index (size 1 on v5e/v6e)
        i = pl.program_id(1)          # reduction step

        @pl.when(i == 0)
        def _():
            o_ref[...] = jnp.zeros_like(o_ref)

        x = x_ref[...].astype(jnp.float32)
        y = y_ref[...].astype(jnp.float32)

        diff = x - y
        sq = diff * diff
        flood = y > 0.0               # padded tail has y == 0 -> not flood

        if needs_mask:
            # Last row-block is partial: trailing rows of the VMEM tile hold
            # unspecified data.  Select it away (select, not multiply, so even
            # NaN garbage contributes exactly zero).
            row0 = (c * steps + i) * block_rows
            local = jax.lax.broadcasted_iota(jnp.int32, (block_rows, _LANES), 0)
            valid = (local + row0) < rows
            sq = jnp.where(valid, sq, 0.0)
            flood = jnp.logical_and(flood, valid)

        fsq = jnp.where(flood, sq, 0.0)
        fcnt = jnp.where(flood, 1.0, 0.0)

        def fold(t):
            # (block_rows, 128) -> (8, 128) using only elementwise (VPU) adds
            # over native (8,128) tiles; the expensive cross-lane reduce runs
            # once, in the JAX wrapper.
            return jnp.sum(t.reshape(block_rows // 8, 8, _LANES), axis=0)

        o_ref[0, 0, :, :] = o_ref[0, 0, :, :] + fold(sq)    # total sq error
        o_ref[0, 1, :, :] = o_ref[0, 1, :, :] + fold(fsq)   # flood sq error
        o_ref[0, 2, :, :] = o_ref[0, 2, :, :] + fold(fcnt)  # flood count

    return kernel


@functools.partial(jax.jit, static_argnames=("reduction", "block_rows"))
def wmse_loss(inputs, targets, reduction="mean", block_rows=None):
    """Pallas implementation of WMSELoss.forward.

    Returns (loss, flood_loss, unflood_loss) as f32 scalars, matching
    F.mse_loss(masked_select(...)) semantics for reduction 'mean' or 'sum'.
    """
    if reduction not in ("mean", "sum"):
        # TODO(synk): reduction='none' returns ragged masked_select tensors with
        # data-dependent shapes -- no fixed-shape Pallas equivalent.
        raise NotImplementedError("reduction must be 'mean' or 'sum'")

    assert inputs.shape == targets.shape
    n = inputs.size
    itemsize = jnp.dtype(inputs.dtype).itemsize
    sublane = max(8, 32 // itemsize)     # 8 for f32, 16 for bf16, 32 for int8

    x = inputs.reshape(-1)
    y = targets.reshape(-1)

    # Lane alignment: pad only to the next multiple of 128 (<= 127 elements).
    # For typical NCHW sizes n % 128 == 0 and this path is never taken, so the
    # (rows, 128) view below is a free reshape of the original HBM buffer.
    rem = n % _LANES
    if rem:
        # Zero padding is harmless: sq == 0 and y == 0 (not flood).
        x = jnp.pad(x, (0, _LANES - rem))
        y = jnp.pad(y, (0, _LANES - rem))
    rows = x.size // _LANES
    x = x.reshape(rows, _LANES)
    y = y.reshape(rows, _LANES)

    # ~2 MiB of input per tile (4 MiB on v7x's faster HBM), scaled by dtype so
    # the per-step DMA stays large enough to amortize grid-step overhead.
    if block_rows is None:
        target_bytes = (4 << 20) if _is_v7x() else (2 << 20)
        block_rows = max(sublane, target_bytes // (_LANES * itemsize))
        block_rows = min(block_rows, pl.cdiv(rows, sublane) * sublane)
    assert block_rows % sublane == 0 and block_rows % 8 == 0

    blocks = pl.cdiv(rows, block_rows)

    # Split row blocks across both TensorCores on v7x; size-1 axis elsewhere.
    cores = 2 if (_is_v7x() and blocks >= 2 and blocks % 2 == 0) else 1
    steps = blocks // cores
    needs_mask = (rows % block_rows) != 0

    kernel = _make_kernel(rows, block_rows, steps, needs_mask)

    in_spec = pl.BlockSpec((block_rows, _LANES), lambda c, i: (c * steps + i, 0))
    out_spec = pl.BlockSpec((1, 3, 8, _LANES), lambda c, i: (c, 0, 0, 0))

    vmem_limit = (48 << 20) if _is_v7x() else (64 << 20)
    cost = pl.CostEstimate(
        flops=10 * rows * _LANES,
        transcendentals=0,
        bytes_accessed=2 * rows * _LANES * itemsize + cores * 3 * 8 * _LANES * 4,
    )

    partial = pl.pallas_call(
        kernel,
        out_shape=jax.ShapeDtypeStruct((cores, 3, 8, _LANES), jnp.float32),
        grid=(cores, steps),
        in_specs=[in_spec, in_spec],
        out_specs=out_spec,
        compiler_params=pltpu.CompilerParams(
            dimension_semantics=("parallel", "arbitrary"),
            vmem_limit_bytes=vmem_limit),
        cost_estimate=cost,
    )(x, y)

    sums = jnp.sum(partial, axis=(0, 2, 3))            # tiny (3,) final reduce
    total_sq, flood_sq, flood_cnt = sums[0], sums[1], sums[2]
    unflood_sq = total_sq - flood_sq
    unflood_cnt = jnp.float32(n) - flood_cnt           # n static; pad excluded

    if reduction == "mean":
        flood_loss = flood_sq / flood_cnt        # NaN if no flood elems (== torch)
        unflood_loss = unflood_sq / unflood_cnt  # NaN if no unflood elems
    else:  # "sum"
        flood_loss = flood_sq
        unflood_loss = unflood_sq

    loss = _FACTOR * flood_loss + unflood_loss
    return loss, flood_loss, unflood_loss


def _reference(inputs, targets, reduction="mean"):
    """Pure-JAX reference mirroring the PyTorch semantics."""
    x = inputs.reshape(-1).astype(jnp.float32)
    y = targets.reshape(-1).astype(jnp.float32)
    sq = (x - y) ** 2
    flood = y > 0.0
    if reduction == "mean":
        fl = jnp.sum(jnp.where(flood, sq, 0.0)) / jnp.sum(flood)
        ul = jnp.sum(jnp.where(flood, 0.0, sq)) / jnp.sum(~flood)
    else:
        fl = jnp.sum(jnp.where(flood, sq, 0.0))
        ul = jnp.sum(jnp.where(flood, 0.0, sq))
    return _FACTOR * fl + ul, fl, ul


if __name__ == "__main__":
    key = jax.random.PRNGKey(0)
    ks = jax.random.split(key, 8)

    def check(a, b, red="mean", rtol=1e-5, atol=1e-5, **kw):
        got = wmse_loss(a, b, reduction=red, **kw)
        jax.block_until_ready(got)
        want = _reference(a, b, reduction=red)
        for g, w in zip(got, want):
            assert jnp.allclose(g, w, rtol=rtol, atol=atol), (red, g, w)

    # 1) NCHW example (lane-aligned zero-copy path): (2, 4, 16, 16).
    shape = (2, 4, 16, 16)
    a = jax.random.normal(ks[0], shape, dtype=jnp.float32)
    b = jax.random.normal(ks[1], shape, dtype=jnp.float32)
    check(a, b, "mean")
    check(a, b, "sum")

    # 2) Non-lane-aligned shape -> exercises the tiny pad-to-128 fallback.
    shape2 = (2, 3, 17, 19)
    a2 = jax.random.normal(ks[2], shape2, dtype=jnp.float32)
    b2 = jax.random.normal(ks[3], shape2, dtype=jnp.float32)
    check(a2, b2, "mean")
    check(a2, b2, "sum")

    # 3) Force small blocks: rows=20, block_rows=8 -> 3 grid steps with a
    #    partial (in-kernel masked) final block.
    shape3 = (1, 5, 4, 128)
    a3 = jax.random.normal(ks[4], shape3, dtype=jnp.float32)
    b3 = jax.random.normal(ks[5], shape3, dtype=jnp.float32)
    check(a3, b3, "mean", block_rows=8)

    # 4) bf16 inputs (cast to f32 inside the kernel).
    a4 = jax.random.normal(ks[6], shape, dtype=jnp.bfloat16)
    b4 = jax.random.normal(ks[7], shape, dtype=jnp.bfloat16)
    check(a4, b4, "mean", rtol=1e-3, atol=1e-3)

    print("KERNEL_OK")
</pallas_src>

<mosaic_0001>
module attributes {stable_mosaic.version = 11 : i64} {
  func.func @kernel(%arg0: i32, %arg1: i32, %arg2: memref<16x128xf32, #tpu.memory_space<vmem>>, %arg3: memref<16x128xf32, #tpu.memory_space<vmem>>, %arg4: memref<1x3x8x128xf32, #tpu.memory_space<vmem>>) attributes {dimension_semantics = [#tpu.dimension_semantics<parallel>, #tpu.dimension_semantics<arbitrary>], iteration_bounds = array<i64: 1, 1>, scalar_prefetch = 0 : i64, scratch_operands = 0 : i64, tpu.core_type = #tpu.core_type<tc>, window_params = [{transform_indices = @transform_0, window_bounds = array<i64: 16, 128>}, {transform_indices = @transform_1, window_bounds = array<i64: 16, 128>}, {transform_indices = @transform_2, window_bounds = array<i64: 1, 3, 8, 128>}]} {
    %c0_i32 = arith.constant 0 : i32
    %0 = arith.cmpi eq, %arg1, %c0_i32 : i32
    %1 = arith.extui %0 : i1 to i32
    %c0_i32_0 = arith.constant 0 : i32
    %2 = arith.cmpi ne, %1, %c0_i32_0 : i32
    scf.if %2 {
      %cst_32 = arith.constant 0.000000e+00 : f32
      %38 = vector.broadcast %cst_32 : f32 to vector<1x3x8x128xf32>
      %c0_33 = arith.constant 0 : index
      %c0_34 = arith.constant 0 : index
      %c0_35 = arith.constant 0 : index
      %c0_36 = arith.constant 0 : index
      %39 = vector.load %arg4[%c0_33, %c0_34, %c0_35, %c0_36] : memref<1x3x8x128xf32, #tpu.memory_space<vmem>>, vector<1x3x8x128xf32>
      tpu.vector_store %arg4[%c0_33, %c0_34, %c0_35, %c0_36], %38 {strides = array<i32>} : memref<1x3x8x128xf32, #tpu.memory_space<vmem>>, vector<1x3x8x128xf32>,
    } else {
    }
    %c0 = arith.constant 0 : index
    %c0_1 = arith.constant 0 : index
    %3 = vector.load %arg2[%c0, %c0_1] : memref<16x128xf32, #tpu.memory_space<vmem>>, vector<16x128xf32>
    %c0_2 = arith.constant 0 : index
    %c0_3 = arith.constant 0 : index
    %4 = vector.load %arg3[%c0_2, %c0_3] : memref<16x128xf32, #tpu.memory_space<vmem>>, vector<16x128xf32>
    %5 = arith.subf %3, %4 : vector<16x128xf32>
    %6 = arith.mulf %5, %5 : vector<16x128xf32>
    %cst = arith.constant 0.000000e+00 : f32
    %7 = vector.broadcast %cst : f32 to vector<16x128xf32>
    %8 = arith.cmpf ogt, %4, %7 : vector<16x128xf32>
    %cst_4 = arith.constant 0.000000e+00 : f32
    %9 = vector.broadcast %cst_4 : f32 to vector<16x128xf32>
    %10 = arith.select %8, %6, %9 : vector<16x128xi1>, vector<16x128xf32>
    %cst_5 = arith.constant 1.000000e+00 : f32
    %cst_6 = arith.constant 0.000000e+00 : f32
    %11 = vector.broadcast %cst_5 : f32 to vector<16x128xf32>
    %12 = vector.broadcast %cst_6 : f32 to vector<16x128xf32>
    %13 = arith.select %8, %11, %12 : vector<16x128xi1>, vector<16x128xf32>
    %c0_7 = arith.constant 0 : index
    %c0_8 = arith.constant 0 : index
    %c0_9 = arith.constant 0 : index
    %c0_10 = arith.constant 0 : index
    %14 = vector.load %arg4[%c0_7, %c0_8, %c0_9, %c0_10] : memref<1x3x8x128xf32, #tpu.memory_space<vmem>>, vector<1x1x8x128xf32>
    %15 = vector.shape_cast %14 : vector<1x1x8x128xf32> to vector<8x128xf32>
    %16 = vector.shape_cast %6 : vector<16x128xf32> to vector<2x8x128xf32>
    %cst_11 = arith.constant dense<0.000000e+00> : vector<8x128xf32>
    %17 = vector.multi_reduction <add>, %16, %cst_11 [0] : vector<2x8x128xf32> to vector<8x128xf32>
    %18 = arith.addf %15, %17 : vector<8x128xf32>
    %c0_12 = arith.constant 0 : index
    %c0_13 = arith.constant 0 : index
    %c0_14 = arith.constant 0 : index
    %c0_15 = arith.constant 0 : index
    %19 = vector.load %arg4[%c0_12, %c0_13, %c0_14, %c0_15] : memref<1x3x8x128xf32, #tpu.memory_space<vmem>>, vector<1x1x8x128xf32>
    %20 = vector.shape_cast %19 : vector<1x1x8x128xf32> to vector<8x128xf32>
    %21 = vector.shape_cast %18 : vector<8x128xf32> to vector<1x1x8x128xf32>
    tpu.vector_store %arg4[%c0_12, %c0_13, %c0_14, %c0_15], %21 {strides = array<i32>} : memref<1x3x8x128xf32, #tpu.memory_space<vmem>>, vector<1x1x8x128xf32>,
    %c0_16 = arith.constant 0 : index
    %c1 = arith.constant 1 : index
    %c0_17 = arith.constant 0 : index
    %c0_18 = arith.constant 0 : index
    %22 = vector.load %arg4[%c0_16, %c1, %c0_17, %c0_18] : memref<1x3x8x128xf32, #tpu.memory_space<vmem>>, vector<1x1x8x128xf32>
    %23 = vector.shape_cast %22 : vector<1x1x8x128xf32> to vector<8x128xf32>
    %24 = vector.shape_cast %10 : vector<16x128xf32> to vector<2x8x128xf32>
    %cst_19 = arith.constant dense<0.000000e+00> : vector<8x128xf32>
    %25 = vector.multi_reduction <add>, %24, %cst_19 [0] : vector<2x8x128xf32> to vector<8x128xf32>
    %26 = arith.addf %23, %25 : vector<8x128xf32>
    %c0_20 = arith.constant 0 : index
    %c1_21 = arith.constant 1 : index
    %c0_22 = arith.constant 0 : index
    %c0_23 = arith.constant 0 : index
    %27 = vector.load %arg4[%c0_20, %c1_21, %c0_22, %c0_23] : memref<1x3x8x128xf32, #tpu.memory_space<vmem>>, vector<1x1x8x128xf32>
    %28 = vector.shape_cast %27 : vector<1x1x8x128xf32> to vector<8x128xf32>
    %29 = vector.shape_cast %26 : vector<8x128xf32> to vector<1x1x8x128xf32>
    tpu.vector_store %arg4[%c0_20, %c1_21, %c0_22, %c0_23], %29 {strides = array<i32>} : memref<1x3x8x128xf32, #tpu.memory_space<vmem>>, vector<1x1x8x128xf32>,
    %c0_24 = arith.constant 0 : index
    %c2 = arith.constant 2 : index
    %c0_25 = arith.constant 0 : index
    %c0_26 = arith.constant 0 : index
    %30 = vector.load %arg4[%c0_24, %c2, %c0_25, %c0_26] : memref<1x3x8x128xf32, #tpu.memory_space<vmem>>, vector<1x1x8x128xf32>
    %31 = vector.shape_cast %30 : vector<1x1x8x128xf32> to vector<8x128xf32>
    %32 = vector.shape_cast %13 : vector<16x128xf32> to vector<2x8x128xf32>
    %cst_27 = arith.constant dense<0.000000e+00> : vector<8x128xf32>
    %33 = vector.multi_reduction <add>, %32, %cst_27 [0] : vector<2x8x128xf32> to vector<8x128xf32>
    %34 = arith.addf %31, %33 : vector<8x128xf32>
    %c0_28 = arith.constant 0 : index
    %c2_29 = arith.constant 2 : index
    %c0_30 = arith.constant 0 : index
    %c0_31 = arith.constant 0 : index
    %35 = vector.load %arg4[%c0_28, %c2_29, %c0_30, %c0_31] : memref<1x3x8x128xf32, #tpu.memory_space<vmem>>, vector<1x1x8x128xf32>
    %36 = vector.shape_cast %35 : vector<1x1x8x128xf32> to vector<8x128xf32>
    %37 = vector.shape_cast %34 : vector<8x128xf32> to vector<1x1x8x128xf32>
    tpu.vector_store %arg4[%c0_28, %c2_29, %c0_30, %c0_31], %37 {strides = array<i32>} : memref<1x3x8x128xf32, #tpu.memory_space<vmem>>, vector<1x1x8x128xf32>,
    return
  }
  func.func @transform_0(%arg0: i32, %arg1: i32) -> (i32, i32) {
    %c1_i32 = arith.constant 1 : i32
    %0 = arith.muli %arg0, %c1_i32 : i32
    %1 = arith.addi %0, %arg1 : i32
    %c0_i32 = arith.constant 0 : i32
    %c0_i32_0 = arith.constant 0 : i32
    return %1, %c0_i32 : i32, i32
  }
  func.func @transform_1(%arg0: i32, %arg1: i32) -> (i32, i32) {
    %c1_i32 = arith.constant 1 : i32
    %0 = arith.muli %arg0, %c1_i32 : i32
    %1 = arith.addi %0, %arg1 : i32
    %c0_i32 = arith.constant 0 : i32
    %c0_i32_0 = arith.constant 0 : i32
    return %1, %c0_i32 : i32, i32
  }
  func.func @transform_2(%arg0: i32, %arg1: i32) -> (i32, i32, i32, i32) {
    %c0_i32 = arith.constant 0 : i32
    %c0_i32_0 = arith.constant 0 : i32
    %c0_i32_1 = arith.constant 0 : i32
    %c0_i32_2 = arith.constant 0 : i32
    return %arg0, %c0_i32, %c0_i32_0, %c0_i32_1 : i32, i32, i32, i32
  }
}

</mosaic_0001>

<bundles_post_ra>
// kernel: wmse_loss.1
= control target key start
LH: loop header
LB: loop body
LE: loop exit
PB: predicated region body
PF: predicated region fallthrough
CT: control target
= control target key end

     0   :  { %7 = vsyncpa [#allocation3], 0  ;;  %s249_s0 = inlined_call_operand.hbm [shape: f32[16,128], index: 0, kind: input, shape index: {}]   ;;  %s250_s1 = inlined_call_operand.hbm [shape: f32[16,128], index: 1, kind: input, shape index: {}]   ;;  %s251_s2 = inlined_call_operand.hbm [shape: f32[1,3,8,128], index: 2, kind: output, shape index: {}]  }
   0x1   :  { %8 = vsyncpa [#allocation6], 0 }
   0x2   :  { %9 = vsyncpa [#allocation4], 0  ;;  %s183_s9 = smov [#allocation2]   ;;  %s111_s13 = scalar_lea.hbm %s249_s0, 256 }
   0x3   :  { %s19_s10 = sshll.u32 %s183_s9, 4  ;;  %p112_p0 = scmp.ne.s32.totalorder %s249_s0, %s111_s13  ;;  %s20_s10 = int_to_ptr.vmem [resolvable:$true] %s19_s10 }
   0x4   :  { %p115_p1 = scmp.lt.u32.totalorder %s111_s13, %s249_s0 }
   0x6   :  { %p117_p2 = pnand %p115_p1, %p112_p0 }
   0x8   :  { %120 = shalt.err (!%p117_p2)
}
   0x9   :  { %s121_s18 = scalar_lea.vmem %s20_s10, 256  ;;  %p126_p4 = scmp.lt.s32.totalorder %s20_s10, %s20_s10 }
   0xa   :  { %p122_p3 = scmp.ne.s32.totalorder %s20_s10, %s121_s18  ;;  %p127_p5 = scmp.lt.s32.totalorder %s121_s18, %s121_s18 }
   0xc   :  { %p128_p6 = por %p127_p5, %p126_p4 }
   0xe   :  { %p129_p7 = pnand %p128_p6, %p122_p3 }
  0x10   :  { %132 = shalt.err (!%p129_p7)
}
  0x11   :  { %s184_s19 = smov 128   ;;  %s185_s20 = smov 8  }
  0x12   :  { %25 = dma.hbm_to_vmem [thread:$0]  %s249_s0, 256, %s20_s10, [#allocation3], %s184_s19, %s184_s19, %s185_s20  }
  0x13   :  { %s186_s23 = smov [#allocation5]   ;;  %s133_s27 = scalar_lea.hbm %s250_s1, 256 }
  0x14   :  { %s35_s24 = sshll.u32 %s186_s23, 4  ;;  %p134_p8 = scmp.ne.s32.totalorder %s250_s1, %s133_s27  ;;  %s36_s24 = int_to_ptr.vmem [resolvable:$true] %s35_s24 }
  0x15   :  { %p137_p9 = scmp.lt.u32.totalorder %s133_s27, %s250_s1 }
  0x17   :  { %p139_p10 = pnand %p137_p9, %p134_p8 }
  0x19   :  { %142 = shalt.err (!%p139_p10)
}
  0x1a   :  { %s143_s4 = scalar_lea.vmem %s36_s24, 256  ;;  %p148_p12 = scmp.lt.s32.totalorder %s36_s24, %s36_s24 }
  0x1b   :  { %p144_p11 = scmp.ne.s32.totalorder %s36_s24, %s143_s4  ;;  %p149_p13 = scmp.lt.s32.totalorder %s143_s4, %s143_s4 }
  0x1d   :  { %p150_p0 = por %p149_p13, %p148_p12 }
  0x1f   :  { %p151_p1 = pnand %p150_p0, %p144_p11 }
  0x21   :  { %154 = shalt.err (!%p151_p1)
}
  0x22   :  { %41 = dma.hbm_to_vmem [thread:$0]  %s250_s1, 256, %s36_s24, [#allocation6], %s184_s19, %s184_s19, %s185_s20  }
  0x23   :  { %177 = dma.done.wait [#allocation3], 256  }
  0x24   :  { %178 = vsyncadd [#allocation3], 4294967040 }
  0x25   :  { %179 = dma.done.wait [#allocation6], 256  }
  0x26   :  { %180 = vsyncadd [#allocation6], 4294967040  ;;  %v59_v0 = vld [vmem:[#allocation2] sm:$0xff]  ;;  %v60_v1 = vld [vmem:[#allocation2 + $0x8] sm:$0xff]  ;;  %v187_v6 = vmov 0.0   ;;  %s188_s1 = smov [#allocation7]  }
  0x27   :  { %v61_v2 = vld [vmem:[#allocation5] sm:$0xff]  ;;  %v62_v3 = vld [vmem:[#allocation5 + $0x8] sm:$0xff]  ;;  %s92_s6 = sshll.u32 %s188_s1, 4  ;;  %s93_s6 = int_to_ptr.vmem [resolvable:$true] %s92_s6 }
  0x28   :  { %v63_v4 = vsub.f32 %v59_v0, %v61_v2  ;;  %vm67_vm0 = vcmp.gt.f32.partialorder %v61_v2, 0.0  ;;  %v64_v5 = vsub.f32 %v60_v1, %v62_v3  ;;  %vm68_vm1 = vcmp.gt.f32.partialorder %v62_v3, 0.0  ;;  %s155_s7 = scalar_lea.vmem %s93_s6, 384  ;;  %p160_p3 = scmp.lt.s32.totalorder %s93_s6, %s93_s6 }
  0x29   :  { %v71_v7 = vsel %vm67_vm0, 1.0, %v187_v6  ;;  %v72_v9 = vsel %vm68_vm1, 1.0, %v187_v6  ;;  %p156_p2 = scmp.ne.s32.totalorder %s93_s6, %s155_s7  ;;  %p161_p4 = scmp.lt.s32.totalorder %s155_s7, %s155_s7 }
  0x2a   :  { %v65_v8 = vmul.f32 %v63_v4, %v63_v4  ;;  %v66_v10 = vmul.f32 %v64_v5, %v64_v5  ;;  %v84_v11 = vadd.f32 %v72_v9, %v71_v7 }
  0x2b   :  { %p162_p5 = por %p161_p4, %p160_p3 }
  0x2c   :  { %v69_v12 = vsel %vm67_vm0, %v65_v8, 0.0  ;;  %v74_v13 = vadd.f32 %v66_v10, %v65_v8  ;;  %v70_v14 = vsel %vm68_vm1, %v66_v10, 0.0  ;;  %86 = vst [vmem:[#allocation7 + $0x10] sm:$0xff] %v84_v11 }
  0x2d   :  { %v79_v15 = vadd.f32 %v70_v14, %v69_v12  ;;  %p163_p6 = pnand %p162_p5, %p156_p2 }
  0x2e   :  { %76 = vst [vmem:[#allocation7] sm:$0xff] %v74_v13 }
  0x2f   :  { %81 = vst [vmem:[#allocation7 + $0x8] sm:$0xff] %v79_v15 }
  0x30   :  { %166 = shalt.err (!%p163_p6)
}
  0x31   :  { %s167_s10 = scalar_lea.hbm %s251_s2, 384 }
  0x32   :  { %p168_p7 = scmp.ne.s32.totalorder %s251_s2, %s167_s10  ;;  %p171_p8 = scmp.lt.u32.totalorder %s167_s10, %s251_s2 }
  0x34   :  { %p173_p9 = pnand %p171_p8, %p168_p7 }
  0x36   :  { %176 = shalt.err (!%p173_p9)
}
  0x37   :  { %98 = dma.vmem_to_hbm [thread:$0]  %s93_s6, 384, %s251_s2, [#allocation4], %s184_s19, %s184_s19, %s185_s20  }
  0x38   :  { %181 = dma.done.wait [#allocation4], 384  }
  0x39   :  { %182 = vsyncadd [#allocation4], 4294966912 }
  0x3a   :  { %102 = vsyncpa [#allocation3], 1 }
  0x3b   :  { %103 = vsyncpa [#allocation6], 1 }
  0x3c   :  { %104 = vsyncpa [#allocation4], 1 }

</bundles_post_ra>
